<compile_context>
chip_gen: v5e
topology: v5e:2x2
jax: 0.10.0
libtpu: 0.0.40
codegen_flags: <defaults>
</compile_context>

<pallas_src>
import functools

import jax
import jax.numpy as jnp
from jax.experimental import pallas as pl
from jax.experimental.pallas import tpu as pltpu


def actor_critic_kernel(s_ref, w1_ref, b1_ref, wh_ref, bh_ref, out_ref, *,
                        num_actions):
    # shared trunk: Linear(state_dim, 256) + ReLU.
    # In-kernel bf16 cast of the f32 state tile; f32 accumulation on the MXU.
    s = s_ref[...].astype(w1_ref.dtype)
    x = jnp.dot(s, w1_ref[...], preferred_element_type=jnp.float32)
    # Fuse bias + ReLU + bf16 downcast (kills the f32 hidden intermediate early).
    x = jnp.maximum(x + b1_ref[...], 0.0).astype(wh_ref.dtype)

    # fused heads: Linear(256, A) || Linear(256, 1), zero-padded to 128 lanes.
    head = jnp.dot(x, wh_ref[...], preferred_element_type=jnp.float32)
    head = head + bh_ref[...]

    # (1, head_n) mask row, broadcast into both selects.
    col = jax.lax.broadcasted_iota(jnp.int32, (1, head.shape[-1]), 1)
    is_logit = col < num_actions

    # Per-row stabilized softmax over the real logit lanes only (per-row max is
    # identical to the PyTorch global-max version: softmax is shift-invariant).
    logits = jnp.where(is_logit, head, -jnp.inf)
    logits = logits - jnp.max(logits, axis=-1, keepdims=True)
    e = jnp.exp(logits)                       # padded lanes -> exp(-inf) = 0
    # Exact division: rows sum to 1 within f32 ulps (approx recip broke this).
    policy = e / jnp.sum(e, axis=-1, keepdims=True)

    # Single lane-dense store: policy in logit lanes, raw head (value) elsewhere.
    out_ref[...] = jnp.where(is_logit, policy, head)


def prepare_params(w1, b1, wp, bp, wv, bv, *, use_bf16=True):
    """One-time packing/casting, hoisted out of the per-call hot path."""
    H, A = wp.shape
    head_n = 128 * pl.cdiv(A + 1, 128)        # fused head out-dim, 128-lane pad
    w_head = jnp.pad(jnp.concatenate([wp, wv], axis=1),
                     ((0, 0), (0, head_n - (A + 1))))
    b_head = jnp.pad(jnp.concatenate([bp, bv], axis=1),
                     ((0, 0), (0, head_n - (A + 1))))
    cdtype = jnp.bfloat16 if use_bf16 else w1.dtype
    return (w1.astype(cdtype), b1.astype(jnp.float32),
            w_head.astype(cdtype), b_head.astype(jnp.float32), int(A))


def actor_critic_forward(state, packed, *, block_b=None):
    w1, b1, wh, bh, num_actions = packed
    B, S = state.shape
    H = w1.shape[1]
    head_n = wh.shape[1]

    if block_b is None:
        # Big tiles amortize the ~0.35us per-grid-step overhead; multiple of 8
        # sublanes; aim for >=2 tiles when B allows so the "parallel" axis can
        # shard across the two TensorCores on v7x.
        block_b = max(8, min(1024, 8 * pl.cdiv(pl.cdiv(B, 2), 8)))
    padded_b = block_b * pl.cdiv(B, block_b)
    if padded_b != B:
        state = jnp.pad(state, ((0, padded_b - B), (0, 0)))

    cost = pl.CostEstimate(
        flops=2 * padded_b * (S * H + H * head_n),
        transcendentals=padded_b * head_n,
        bytes_accessed=(padded_b * 4 * (S + head_n)        # f32 state in, f32 out
                        + (w1.size + wh.size) * 2          # bf16 weights
                        + (b1.size + bh.size) * 4),        # f32 biases
    )

    out = pl.pallas_call(
        functools.partial(actor_critic_kernel, num_actions=num_actions),
        out_shape=jax.ShapeDtypeStruct((padded_b, head_n), jnp.float32),
        grid=(padded_b // block_b,),
        in_specs=[
            pl.BlockSpec((block_b, S), lambda i: (i, 0)),   # f32 state tile
            pl.BlockSpec((S, H), lambda i: (0, 0)),         # W1 (VMEM-resident)
            pl.BlockSpec((1, H), lambda i: (0, 0)),         # b1
            pl.BlockSpec((H, head_n), lambda i: (0, 0)),    # fused head W
            pl.BlockSpec((1, head_n), lambda i: (0, 0)),    # fused head b
        ],
        out_specs=pl.BlockSpec((block_b, head_n), lambda i: (i, 0)),
        compiler_params=pltpu.CompilerParams(
            dimension_semantics=("parallel",)),             # 2-TC shardable
        cost_estimate=cost,
    )(state, w1, b1, wh, bh)

    policy = out[:B, :num_actions]
    value = out[:B, num_actions:num_actions + 1]
    return policy, value


def init_params(key, state_dim, action_dim, hidden=256):
    # Deterministic init mimicking nn.Linear's U(-1/sqrt(fan_in), 1/sqrt(fan_in)).
    k1, k2, k3, k4, k5, k6 = jax.random.split(key, 6)

    def lin(kw, kb, fan_in, fan_out):
        bound = 1.0 / jnp.sqrt(jnp.float32(fan_in))
        w = jax.random.uniform(kw, (fan_in, fan_out), jnp.float32, -bound, bound)
        b = jax.random.uniform(kb, (1, fan_out), jnp.float32, -bound, bound)
        return w, b

    w1, b1 = lin(k1, k2, state_dim, hidden)
    wp, bp = lin(k3, k4, hidden, action_dim)
    wv, bv = lin(k5, k6, hidden, 1)
    return w1, b1, wp, bp, wv, bv


def reference_forward(state, w1, b1, wp, bp, wv, bv, use_bf16=True):
    # Pure-JAX reference mirroring the kernel's bf16-operand / f32-accumulate
    # numerics. Uses the GLOBAL max like the PyTorch module (softmax is per-row
    # shift-invariant, so this matches the kernel's per-row max).
    c = jnp.bfloat16 if use_bf16 else jnp.float32
    x = jnp.dot(state.astype(c), w1.astype(c),
                preferred_element_type=jnp.float32) + b1
    x = jnp.maximum(x, 0.0)
    logits = jnp.dot(x.astype(c), wp.astype(c),
                     preferred_element_type=jnp.float32) + bp
    logits = logits - jnp.max(logits)
    policy = jax.nn.softmax(logits, axis=-1)
    value = jnp.dot(x.astype(c), wv.astype(c),
                    preferred_element_type=jnp.float32) + bv
    return policy, value


if __name__ == "__main__":
    B, STATE_DIM, ACTION_DIM = 4, 16, 8

    key = jax.random.PRNGKey(0)
    k_state, k_params = jax.random.split(key)

    state = jax.random.normal(k_state, (B, STATE_DIM), jnp.float32)
    raw_params = init_params(k_params, STATE_DIM, ACTION_DIM)
    packed = prepare_params(*raw_params)          # one-time packing + bf16 cast

    policy, value = actor_critic_forward(state, packed)
    jax.block_until_ready((policy, value))

    ref_policy, ref_value = reference_forward(state, *raw_params)
    assert policy.shape == (B, ACTION_DIM) and value.shape == (B, 1)
    assert policy.dtype == jnp.float32 and value.dtype == jnp.float32
    # bf16 MXU operands -> modest tolerances (f32 accumulation, exact softmax div)
    assert jnp.allclose(policy, ref_policy, atol=2e-3, rtol=2e-3)
    assert jnp.allclose(value, ref_value, atol=1e-3, rtol=1e-3)
    assert jnp.allclose(jnp.sum(policy, axis=-1), 1.0, atol=1e-3)

    print("KERNEL_OK")
</pallas_src>

<mosaic_0001>
module attributes {stable_mosaic.version = 11 : i64} {
  func.func @actor_critic_kernel(%arg0: i32, %arg1: memref<8x16xf32, #tpu.memory_space<vmem>>, %arg2: memref<16x256xbf16, #tpu.memory_space<vmem>>, %arg3: memref<1x256xf32, #tpu.memory_space<vmem>>, %arg4: memref<256x128xbf16, #tpu.memory_space<vmem>>, %arg5: memref<1x128xf32, #tpu.memory_space<vmem>>, %arg6: memref<8x128xf32, #tpu.memory_space<vmem>>) attributes {dimension_semantics = [#tpu.dimension_semantics<parallel>], iteration_bounds = array<i64: 1>, scalar_prefetch = 0 : i64, scratch_operands = 0 : i64, tpu.core_type = #tpu.core_type<tc>, window_params = [{transform_indices = @transform_0, window_bounds = array<i64: 8, 16>}, {pipeline_mode = #tpu.pipeline_mode<synchronous>, transform_indices = @transform_1, window_bounds = array<i64: 16, 256>}, {pipeline_mode = #tpu.pipeline_mode<synchronous>, transform_indices = @transform_2, window_bounds = array<i64: 1, 256>}, {pipeline_mode = #tpu.pipeline_mode<synchronous>, transform_indices = @transform_3, window_bounds = array<i64: 256, 128>}, {pipeline_mode = #tpu.pipeline_mode<synchronous>, transform_indices = @transform_4, window_bounds = array<i64: 1, 128>}, {transform_indices = @transform_5, window_bounds = array<i64: 8, 128>}]} {
    %c0 = arith.constant 0 : index
    %c0_0 = arith.constant 0 : index
    %0 = vector.load %arg1[%c0, %c0_0] : memref<8x16xf32, #tpu.memory_space<vmem>>, vector<8x16xf32>
    %1 = arith.truncf %0 : vector<8x16xf32> to vector<8x16xbf16>
    %c0_1 = arith.constant 0 : index
    %c0_2 = arith.constant 0 : index
    %2 = vector.load %arg2[%c0_1, %c0_2] : memref<16x256xbf16, #tpu.memory_space<vmem>>, vector<16x256xbf16>
    %cst = arith.constant dense<0.000000e+00> : vector<8x256xf32>
    %3 = tpu.matmul %1, %2, %cst {dimension_numbers = #tpu.dot_dimension_numbers<[1], [0], [0], [1], [0, 0, 1, 1], [], []>} : vector<8x16xbf16>, vector<16x256xbf16>, vector<8x256xf32> -> vector<8x256xf32>
    %c0_3 = arith.constant 0 : index
    %c0_4 = arith.constant 0 : index
    %4 = vector.load %arg3[%c0_3, %c0_4] : memref<1x256xf32, #tpu.memory_space<vmem>>, vector<1x256xf32>
    %5 = vector.broadcast %4 : vector<1x256xf32> to vector<8x256xf32>
    %6 = arith.addf %3, %5 : vector<8x256xf32>
    %cst_5 = arith.constant 0.000000e+00 : f32
    %7 = vector.broadcast %cst_5 : f32 to vector<8x256xf32>
    %8 = arith.maximumf %6, %7 : vector<8x256xf32>
    %9 = arith.truncf %8 : vector<8x256xf32> to vector<8x256xbf16>
    %c0_6 = arith.constant 0 : index
    %c0_7 = arith.constant 0 : index
    %10 = vector.load %arg4[%c0_6, %c0_7] : memref<256x128xbf16, #tpu.memory_space<vmem>>, vector<256x128xbf16>
    %cst_8 = arith.constant dense<0.000000e+00> : vector<8x128xf32>
    %11 = tpu.matmul %9, %10, %cst_8 {dimension_numbers = #tpu.dot_dimension_numbers<[1], [0], [0], [1], [0, 0, 1, 1], [], []>} : vector<8x256xbf16>, vector<256x128xbf16>, vector<8x128xf32> -> vector<8x128xf32>
    %c0_9 = arith.constant 0 : index
    %c0_10 = arith.constant 0 : index
    %12 = vector.load %arg5[%c0_9, %c0_10] : memref<1x128xf32, #tpu.memory_space<vmem>>, vector<1x128xf32>
    %13 = vector.broadcast %12 : vector<1x128xf32> to vector<8x128xf32>
    %14 = arith.addf %11, %13 : vector<8x128xf32>
    %15 = tpu.iota {dimensions = array<i32: 1>} : vector<1x128xi32>
    %c8_i32 = arith.constant 8 : i32
    %16 = vector.broadcast %c8_i32 : i32 to vector<1x128xi32>
    %17 = arith.cmpi slt, %15, %16 : vector<1x128xi32>
    %cst_11 = arith.constant 0xFF800000 : f32
    %18 = vector.shape_cast %17 : vector<1x128xi1> to vector<1x128xi1>
    %19 = vector.broadcast %18 : vector<1x128xi1> to vector<8x128xi1>
    %20 = vector.broadcast %cst_11 : f32 to vector<8x128xf32>
    %21 = arith.select %19, %14, %20 : vector<8x128xi1>, vector<8x128xf32>
    %cst_12 = arith.constant dense<0xFF800000> : vector<8xf32>
    %22 = vector.multi_reduction <maximumf>, %21, %cst_12 [1] : vector<8x128xf32> to vector<8xf32>
    %23 = vector.shape_cast %22 : vector<8xf32> to vector<8x1xf32>
    %24 = vector.broadcast %23 : vector<8x1xf32> to vector<8x128xf32>
    %25 = arith.subf %21, %24 : vector<8x128xf32>
    %26 = math.exp %25 : vector<8x128xf32>
    %cst_13 = arith.constant dense<0.000000e+00> : vector<8xf32>
    %27 = vector.multi_reduction <add>, %26, %cst_13 [1] : vector<8x128xf32> to vector<8xf32>
    %28 = vector.shape_cast %27 : vector<8xf32> to vector<8x1xf32>
    %29 = vector.broadcast %28 : vector<8x1xf32> to vector<8x128xf32>
    %30 = arith.divf %26, %29 : vector<8x128xf32>
    %31 = vector.shape_cast %17 : vector<1x128xi1> to vector<1x128xi1>
    %32 = vector.broadcast %31 : vector<1x128xi1> to vector<8x128xi1>
    %33 = arith.select %32, %30, %14 : vector<8x128xi1>, vector<8x128xf32>
    %c0_14 = arith.constant 0 : index
    %c0_15 = arith.constant 0 : index
    %34 = vector.load %arg6[%c0_14, %c0_15] : memref<8x128xf32, #tpu.memory_space<vmem>>, vector<8x128xf32>
    tpu.vector_store %arg6[%c0_14, %c0_15], %33 {strides = array<i32>} : memref<8x128xf32, #tpu.memory_space<vmem>>, vector<8x128xf32>,
    return
  }
  func.func @transform_0(%arg0: i32) -> (i32, i32) {
    %c0_i32 = arith.constant 0 : i32
    %c0_i32_0 = arith.constant 0 : i32
    return %arg0, %c0_i32 : i32, i32
  }
  func.func @transform_1(%arg0: i32) -> (i32, i32) {
    %c0_i32 = arith.constant 0 : i32
    %c0_i32_0 = arith.constant 0 : i32
    %c0_i32_1 = arith.constant 0 : i32
    return %c0_i32, %c0_i32_0 : i32, i32
  }
  func.func @transform_2(%arg0: i32) -> (i32, i32) {
    %c0_i32 = arith.constant 0 : i32
    %c0_i32_0 = arith.constant 0 : i32
    %c0_i32_1 = arith.constant 0 : i32
    return %c0_i32, %c0_i32_0 : i32, i32
  }
  func.func @transform_3(%arg0: i32) -> (i32, i32) {
    %c0_i32 = arith.constant 0 : i32
    %c0_i32_0 = arith.constant 0 : i32
    %c0_i32_1 = arith.constant 0 : i32
    return %c0_i32, %c0_i32_0 : i32, i32
  }
  func.func @transform_4(%arg0: i32) -> (i32, i32) {
    %c0_i32 = arith.constant 0 : i32
    %c0_i32_0 = arith.constant 0 : i32
    %c0_i32_1 = arith.constant 0 : i32
    return %c0_i32, %c0_i32_0 : i32, i32
  }
  func.func @transform_5(%arg0: i32) -> (i32, i32) {
    %c0_i32 = arith.constant 0 : i32
    %c0_i32_0 = arith.constant 0 : i32
    return %arg0, %c0_i32 : i32, i32
  }
}

</mosaic_0001>

<bundles_post_ra>
// kernel: tpu_custom_call.1
= control target key start
LH: loop header
LB: loop body
LE: loop exit
PB: predicated region body
PF: predicated region fallthrough
CT: control target
= control target key end

     0   :  { %10 = vsyncpa [#allocation3], 0  ;;  %s635_s0 = inlined_call_operand.hbm [shape: f32[8,16], index: 0, kind: input, shape index: {}]   ;;  %s636_s1 = inlined_call_operand.hbm [shape: bf16[16,256], index: 1, kind: input, shape index: {}]   ;;  %s637_s2 = inlined_call_operand.hbm [shape: f32[1,256], index: 2, kind: input, shape index: {}]   ;;  %s638_s3 = inlined_call_operand.hbm [shape: bf16[256,128], index: 3, kind: input, shape index: {}]   ;;  %s639_s4 = inlined_call_operand.vmem [shape: f32[1,128], index: 4, kind: input, shape index: {}]   ;;  %s640_s5 = inlined_call_operand.hbm [shape: f32[8,128], index: 5, kind: output, shape index: {}]  }
   0x1   :  { %11 = vsyncpa [#allocation6], 0 }
   0x2   :  { %12 = vsyncpa [#allocation9], 0  ;;  %s29_s20 = sshll.u32 %s636_s1, 4  ;;  %s30_s20 = int_to_ptr.hbm [resolvable:$true] %s29_s20 }
   0x3   :  { %13 = vsyncpa [#allocation4], 0  ;;  %s576_s21 = smov [#allocation5]   ;;  %s19_s25 = sshll.u32 %s635_s0, 4  ;;  %s20_s25 = int_to_ptr.hbm [resolvable:$true] %s19_s25 }
   0x4   :  { %s31_s22 = sshll.u32 %s576_s21, 4  ;;  %s577_s26 = smov 128   ;;  %s32_s22 = int_to_ptr.vmem [resolvable:$true] %s31_s22 }
   0x5   :  { %s578_s27 = smov 8   ;;  %s579_s28 = smov [#allocation2]  }
   0x6   :  { %37 = dma.hbm_to_vmem [thread:$0]  %s30_s20, 256, %s32_s22, [#allocation6], %s577_s26, %s577_s26, %s578_s27  }
   0x7   :  { %s21_s29 = sshll.u32 %s579_s28, 4  ;;  %s43_s7 = sshll.u32 %s637_s2, 4  ;;  %s22_s29 = int_to_ptr.vmem [resolvable:$true] %s21_s29  ;;  %s44_s7 = int_to_ptr.hbm [resolvable:$true] %s43_s7 }
   0x8   :  { %24 = dma.hbm_to_vmem [thread:$0]  %s20_s25, 128, %s22_s29, [#allocation3]  }
   0x9   :  { %s53_s9 = sshll.u32 %s638_s3, 4  ;;  %s580_s10 = smov [#allocation7]   ;;  %s54_s9 = int_to_ptr.hbm [resolvable:$true] %s53_s9 }
   0xa   :  { %s45_s11 = sshll.u32 %s580_s10, 4  ;;  %s581_s0 = smov [#allocation8]   ;;  %s46_s11 = int_to_ptr.vmem [resolvable:$true] %s45_s11 }
   0xb   :  { %48 = dma.hbm_to_vmem [thread:$0]  %s44_s7, 32, %s46_s11, [#allocation6]  }
   0xc   :  { %s55_s12 = sshll.u32 %s581_s0, 4  ;;  %s582_s13 = smov 64   ;;  %s56_s12 = int_to_ptr.vmem [resolvable:$true] %s55_s12 }
   0xd   :  { %s583_s14 = smov 4  }
   0xe   :  { %61 = dma.hbm_to_vmem [thread:$0]  %s54_s9, 2048, %s56_s12, [#allocation9], %s582_s13, %s582_s13, %s583_s14  }
   0xf   :  { %568 = dma.done.wait [#allocation3], 128  }
  0x10   :  { %569 = vsyncadd [#allocation3], 4294967168 }
  0x11   :  { %570 = dma.done.wait [#allocation6], 288  }
  0x12   :  { %571 = vsyncadd [#allocation6], 4294967008 }
  0x13   :  { %572 = dma.done.wait [#allocation9], 2048  }
  0x14   :  { %573 = vsyncadd [#allocation9], 4294965248  ;;  %v344_v0 = vld [vmem:[#allocation5] sm:$0xf]  ;;  %v417_v1 = vld [vmem:[#allocation5 + $0x4] sm:$0xf0]  ;;  %v293_v37 = vlaneseq }
  0x15   :  { %v416_v2 = vld [vmem:[#allocation5 + $0x4] sm:$0xf]  ;;  %v345_v3 = vor.u32 %v417_v1, %v344_v0  ;;  %v346_v4 = vld [vmem:[#allocation5 + $0x8] sm:$0xf0]  ;;  %v81_v5 = vld [vmem:[#allocation2] sm:$0xff]  ;;  %vm101_vm0 = vcmask 130048  }
  0x16   :  { %v425_v6 = vld [vmem:[#allocation8 + $0x38] sm:$0xff]  ;;  %v349_v7 = vor.u32 %v416_v2, %v346_v4  ;;  %v82_v8 = vpack.c.bf16 %v81_v5, %v81_v5  ;;  %v424_v10 = vld [vmem:[#allocation8 + $0x30] sm:$0xff]  ;;  %v423_v12 = vld [vmem:[#allocation8 + $0x28] sm:$0xff]  ;;  %v294_v39 = vand.u32 127, %v293_v37  ;;  %s330_s18 = sshll.u32 %s640_s5, 4  ;;  %s331_s18 = int_to_ptr.hbm [resolvable:$true] %s330_s18 }
  0x17   :  { %v433_v9 = vld [vmem:[#allocation8 + $0x78] sm:$0xff]  ;;  %112 = vmatpush.bf16.msra.mxu0 %v345_v3  ;;  %267 = vmatpush.bf16.msra.mxu2 %v425_v6  ;;  %v432_v11 = vld [vmem:[#allocation8 + $0x70] sm:$0xff]  ;;  %v431_v13 = vld [vmem:[#allocation8 + $0x68] sm:$0xff] }
  0x18   :  { %125 = vmatpush.bf16.msra.mxu1 %v349_v7  ;;  %280 = vmatpush.bf16.msra.mxu3 %v433_v9  ;;  %v422_v14 = vld [vmem:[#allocation8 + $0x20] sm:$0xff]  ;;  %v421_v16 = vld [vmem:[#allocation8 + $0x18] sm:$0xff]  ;;  %v420_v18 = vld [vmem:[#allocation8 + $0x10] sm:$0xff]  ;;  %vm295_vm1 = vcmp.lt.s32.totalorder %v294_v39, 8 }
  0x19   :  { %v430_v15 = vld [vmem:[#allocation8 + $0x60] sm:$0xff]  ;;  %v429_v17 = vld [vmem:[#allocation8 + $0x58] sm:$0xff]  ;;  %v428_v19 = vld [vmem:[#allocation8 + $0x50] sm:$0xff] }
  0x1a   :  { %350 = vmatmul.msk.bf16.vlgmr.msra.gmra.mxu0 %vm101_vm0, %v82_v8  ;;  %v419_v20 = vld [vmem:[#allocation8 + $0x8] sm:$0xff]  ;;  %v418_v22 = vld [vmem:[#allocation8] sm:$0xff]  ;;  %v85_v24 = vld [vmem:[#allocation7] sm:$0x3] }
  0x1b   :  { %351 = vmatmul.msk.bf16.vlgmr.msra.gmra.mxu1 %vm101_vm0, %v82_v8  ;;  %268 = vmatpush.bf16.msra.mxu2 %v424_v10  ;;  %v427_v21 = vld [vmem:[#allocation8 + $0x48] sm:$0xff]  ;;  %v426_v23 = vld [vmem:[#allocation8 + $0x40] sm:$0xff]  ;;  %v87_v25 = vperm.slane %v85_v24, 0  ;;  %v88_v26 = vperm.slane %v85_v24, 1 }
  0x1c   :  { %281 = vmatpush.bf16.msra.mxu3 %v432_v11  ;;  %v443_v38 = vld [vmem:[%s639_s4] ss:$0 sm:$0xff]  ;;  %s584_s4 = smov [#allocation10]  }
  0x1d   :  { %s328_s15 = sshll.u32 %s584_s4, 4  ;;  %s329_s15 = int_to_ptr.vmem [resolvable:$true] %s328_s15 }
  0x1f   :  { %269 = vmatpush.bf16.msra.mxu2 %v423_v12 }
  0x20   :  { %282 = vmatpush.bf16.msra.mxu3 %v431_v13 }
  0x23   :  { %270 = vmatpush.bf16.msra.mxu2 %v422_v14 }
  0x24   :  { %283 = vmatpush.bf16.msra.mxu3 %v430_v15 }
  0x27   :  { %271 = vmatpush.bf16.msra.mxu2 %v421_v16 }
  0x28   :  { %284 = vmatpush.bf16.msra.mxu3 %v429_v17 }
  0x2b   :  { %272 = vmatpush.bf16.msra.mxu2 %v420_v18 }
  0x2c   :  { %285 = vmatpush.bf16.msra.mxu3 %v428_v19 }
  0x2f   :  { %273 = vmatpush.bf16.msra.mxu2 %v419_v20 }
  0x30   :  { %286 = vmatpush.bf16.msra.mxu3 %v427_v21 }
  0x33   :  { %274 = vmatpush.bf16.msra.mxu2 %v418_v22 }
  0x34   :  { %287 = vmatpush.bf16.msra.mxu3 %v426_v23 }
  0x97   :  { %v114_v27 = vpop.f32.mrf.mxu0 }
  0x98   :  { %v115_v28 = vadd.f32 %v114_v27, %v87_v25  ;;  %v127_v29 = vpop.f32.mrf.mxu1 }
  0x99   :  { %v128_v30 = vadd.f32 %v127_v29, %v88_v26 }
  0x9a   :  { %v131_v31 = vmax.f32 %v115_v28, 0.0 }
  0x9b   :  { %v132_v32 = vmax.f32 %v128_v30, 0.0 }
  0x9c   :  { %v133_v33 = vpack.c.bf16 %v131_v31, %v131_v31 }
  0x9d   :  { %v134_v34 = vpack.c.bf16 %v132_v32, %v132_v32 }
  0x9e   :  { %275 = vmatmul.bf16.vlgmr.msra.gmra.mxu2 %v133_v33 }
  0x9f   :  { %288 = vmatmul.bf16.vlgmr.msra.gmra.mxu3 %v134_v34  ;;  %v116_v35 = vpop.f32.mrf.mxu0 }
  0xa0   :  { %v129_v36 = vpop.f32.mrf.mxu1 }
 0x121   :  { %v276_v40 = vpop.f32.mrf.mxu2 }
 0x122   :  { %v277_v41 = vadd.f32 %v443_v38, %v276_v40  ;;  %v289_v42 = vpop.f32.mrf.mxu3 }
 0x124   :  { %v290_v43 = vadd.f32 %v289_v42, %v277_v41 }
 0x126   :  { %v298_v44 = vsel %vm295_vm1, %v290_v43, -inf }
 0x127   :  { %299 = vmax.xlane.f32.xlu0 %v298_v44 }
 0x129   :  { %v278_v45 = vpop.f32.mrf.mxu2 }
 0x12a   :  { %v291_v46 = vpop.f32.mrf.mxu3 }
 0x19a   :  { %v300_v47 = vpop.xlane.xlu0 %299 }
 0x19b   :  { %v301_v48 = vsub.f32 %v298_v44, %v300_v47 }
 0x19d   :  { %v302_v49 = vmul.f32 1.442695, %v301_v48 }
 0x19f   :  { %444 = vpow2.f32 %v302_v49 }
 0x1a5   :  { %v445_v50 = vpop.eup %444 }
 0x1a6   :  { %304 = vadd.xlane.f32.xlu0 %v445_v50 }
 0x219   :  { %v305_v51 = vpop.xlane.xlu0 %304 }
 0x21a   :  { %446 = vrcp.f32 %v305_v51  ;;  %v317_v55 = vand.u32 2147483648, %v305_v51  ;;  %v315_v57 = vand.u32 2147483647, %v305_v51  ;;  %vm311_vm3 = vweird.f32 %v305_v51 }
 0x21c   :  { %v318_v59 = vor.u32 1.1754944e-38, %v317_v55  ;;  %vm316_vm5 = vcmp.eq.f32.partialorder %v315_v57, 8.507059e+37 }
 0x220   :  { %v447_v52 = vpop.eup %446 }
 0x221   :  { %v307_v53 = vmul.f32 %v447_v52, %v305_v51  ;;  %vm312_vm2 = vweird.f32 %v447_v52 }
 0x222   :  { %vm313_vm4 = vmor %vm311_vm3, %vm312_vm2 }
 0x223   :  { %v308_v54 = vsub.f32 1.0, %v307_v53 }
 0x225   :  { %v309_v56 = vmul.f32 %v447_v52, %v308_v54 }
 0x227   :  { %v310_v58 = vadd.f32 %v447_v52, %v309_v56 }
 0x229   :  { %v314_v60 = vsel %vm313_vm4, %v447_v52, %v310_v58 }
 0x22a   :  { %v319_v61 = vsel %vm316_vm5, %v318_v59, %v314_v60 }
 0x22b   :  { %v320_v62 = vmul.f32 %v445_v50, %v319_v61 }
 0x22d   :  { %v321_v63 = vsel %vm295_vm1, %v320_v62, %v290_v43 }
 0x22e   :  { %322 = vst [vmem:[#allocation10] sm:$0xff] %v321_v63 }
 0x22f   :  { %333 = dma.vmem_to_hbm [thread:$0]  %s329_s15, 128, %s331_s18, [#allocation4]  }
 0x230   :  { %574 = dma.done.wait [#allocation4], 128  }
 0x231   :  { %575 = vsyncadd [#allocation4], 4294967168 }
 0x232   :  { %338 = vsyncpa [#allocation3], 1 }
 0x233   :  { %339 = vsyncpa [#allocation6], 1 }
 0x234   :  { %340 = vsyncpa [#allocation9], 1 }
 0x235   :  { %341 = vsyncpa [#allocation4], 1 }

</bundles_post_ra>
